<compile_context>
chip_gen: v6e
topology: v6e:2x2x1
jax: 0.10.0
libtpu: 0.0.40
codegen_flags: <defaults>
</compile_context>

<pallas_src>
import math
from functools import partial

import jax
import jax.numpy as jnp
from jax import lax
from jax.experimental import pallas as pl
from jax.experimental.pallas import tpu as pltpu


def _round_up(v, m):
    return ((v + m - 1) // m) * m


def _cdiv(a, b):
    return (a + b - 1) // b


def _vmem_capacity_bytes():
    try:
        return int(pltpu.get_tpu_info().vmem_capacity_bytes)
    except Exception:
        return 64 << 20  # conservative fallback: v7x per-TensorCore VMEM


def _gcn_kernel(adj_ref, x_ref, w_ref, b_ref, out_ref, acc_ref, *, n, tk):
    """One (row-tile, K-tile) grid step of out = (adj @ x) @ w + b."""
    k = pl.program_id(1)

    @pl.when(k == 0)
    def _init():
        acc_ref[...] = jnp.zeros_like(acc_ref)

    adj_blk = adj_ref[...]
    x_blk = x_ref[...]
    if n % tk:  # static: masking code only emitted when the K grid has a ragged tail
        lim = n - k * tk
        col_ids = lax.broadcasted_iota(jnp.int32, (1, tk), 1)
        row_ids = lax.broadcasted_iota(jnp.int32, (tk, 1), 0)
        # Zero both sides of the tail so clipped-edge garbage (possibly NaN)
        # can never contaminate the accumulation.
        adj_blk = jnp.where(col_ids < lim, adj_blk, 0)
        x_blk = jnp.where(row_ids < lim, x_blk, 0)

    acc_ref[...] += jnp.dot(adj_blk, x_blk, preferred_element_type=jnp.float32)

    @pl.when(k == pl.num_programs(1) - 1)
    def _finish():
        out = jnp.dot(acc_ref[...], w_ref[...],
                      preferred_element_type=jnp.float32)
        out_ref[...] = (out + b_ref[...]).astype(out_ref.dtype)


def _pick_tiles(n, in_f_pad, out_f_pad, comp_bytes, budget):
    sub_mult = 8 * (4 // comp_bytes)  # sublane packing: 8 f32 / 16 bf16 / 32 int8

    # Row tile: large, rounded to the packing granule; ensure >= 2 row tiles so
    # the "parallel" axis can shard across both v7x TensorCores.
    tm = min(512, n)
    if tm < n:
        tm = max(sub_mult, (tm // sub_mult) * sub_mult)
    while _cdiv(n, tm) < 2:
        half = tm // 2
        cand = (half // sub_mult) * sub_mult
        if cand == 0:
            cand = (half // 8) * 8
        if cand == 0:
            break
        tm = cand

    # K tile (adj columns): lane-dense multiple of 128 (or the full dim when
    # n <= 128, which is always a legal block shape).
    if n <= 128:
        tk = n
    else:
        tk = min(8192, (n // 128) * 128)

    def usage(tm_, tk_):
        return (2 * tm_ * tk_ * comp_bytes          # adj tile (double-buffered)
                + 2 * tk_ * in_f_pad * comp_bytes   # x tile (double-buffered)
                + 2 * tm_ * out_f_pad * 4           # f32 output tile
                + tm_ * in_f_pad * 4                # f32 accumulator scratch
                + 2 * in_f_pad * out_f_pad * 4      # f32 weight (resident)
                + 2 * 8 * out_f_pad * 4)            # bias

    for _ in range(32):
        if usage(tm, tk) <= budget:
            break
        if n > 128 and tk > 128:
            tk = max(128, ((tk // 2) // 128) * 128)
        elif tm > 8:
            half = tm // 2
            cand = max((half // sub_mult) * sub_mult, (half // 8) * 8)
            if cand == 0 or cand >= tm:
                break
            tm = cand
        else:
            break
    return tm, tk


def graph_convolution(x, adj, weight, bias=None, *, compute_dtype=jnp.bfloat16):
    """Pallas implementation of GraphConvolution.forward.

    x:      (N, in_features)             f32
    adj:    (N, N)                       dense adjacency (any float dtype)
    weight: (in_features, out_features)  f32
    bias:   (out_features,) f32 or None
    compute_dtype: dtype fed to the MXU for the big adj@x matmul
                   (accumulation is always f32).
    """
    n, in_f = x.shape
    assert adj.shape == (n, n)
    assert weight.shape[0] == in_f
    out_f = weight.shape[1]
    out_dtype = x.dtype
    comp_bytes = jnp.dtype(compute_dtype).itemsize

    # Lane-dense padding of the small per-feature dims only (never of the
    # N x N adjacency).
    in_f_pad = _round_up(in_f, 128)
    out_f_pad = _round_up(out_f, 128)

    x_c = x.astype(compute_dtype)
    if in_f_pad != in_f:
        x_c = jnp.pad(x_c, ((0, 0), (0, in_f_pad - in_f)))
    w_c = weight.astype(jnp.float32)  # tiny; kept f32 for an accurate epilogue matmul
    if (in_f_pad, out_f_pad) != weight.shape:
        w_c = jnp.pad(w_c, ((0, in_f_pad - in_f), (0, out_f_pad - out_f)))
    if bias is None:
        b_c = jnp.zeros((1, out_f_pad), jnp.float32)
    else:
        b_c = bias.astype(jnp.float32).reshape(1, out_f)
        if out_f_pad != out_f:
            b_c = jnp.pad(b_c, ((0, 0), (0, out_f_pad - out_f)))

    # adj: no wrapper-side padding; a dtype cast (if any) is allowed to fuse
    # into the pallas_call operand via allow_input_fusion.
    adj_c = adj if adj.dtype == compute_dtype else adj.astype(compute_dtype)

    # Generation-aware VMEM budgeting (128 MiB v5e/v6e, 64 MiB v7x).
    cap = _vmem_capacity_bytes()
    vmem_limit = int(cap * 0.78)     # ~100 MiB on v5e/v6e, ~50 MiB on v7x
    budget = int(vmem_limit * 0.85)  # headroom for Mosaic internal scratch
    tm, tk = _pick_tiles(n, in_f_pad, out_f_pad, comp_bytes, budget)

    grid = (_cdiv(n, tm), _cdiv(n, tk))
    kernel = partial(_gcn_kernel, n=n, tk=tk)

    out = pl.pallas_call(
        kernel,
        out_shape=jax.ShapeDtypeStruct((n, out_f_pad), out_dtype),
        grid=grid,
        in_specs=[
            pl.BlockSpec((tm, tk), lambda i, k: (i, k)),               # adj stream
            pl.BlockSpec((tk, in_f_pad), lambda i, k: (k, 0)),         # x stream
            pl.BlockSpec((in_f_pad, out_f_pad), lambda i, k: (0, 0)),  # weight (resident)
            pl.BlockSpec((1, out_f_pad), lambda i, k: (0, 0)),         # bias (resident)
        ],
        out_specs=pl.BlockSpec((tm, out_f_pad), lambda i, k: (i, 0)),
        scratch_shapes=[pltpu.VMEM((tm, in_f_pad), jnp.float32)],
        compiler_params=pltpu.CompilerParams(
            dimension_semantics=("parallel", "arbitrary"),  # megacore rows, K reduction
            vmem_limit_bytes=vmem_limit,
            allow_input_fusion=[True, True, True, True],
        ),
    )(adj_c, x_c, w_c, b_c)

    return out[:, :out_f] if out_f_pad != out_f else out


if __name__ == "__main__":
    def reference(x, adj, weight, bias):
        ref = adj @ (x @ weight)
        return ref + bias[None, :] if bias is not None else ref

    def make_case(key, n, in_f, out_f):
        k_w, k_b, k_x, k_adj = jax.random.split(key, 4)
        stdv = 1.0 / math.sqrt(out_f)
        weight = jax.random.uniform(k_w, (in_f, out_f), jnp.float32, -stdv, stdv)
        bias = jax.random.uniform(k_b, (out_f,), jnp.float32, -stdv, stdv)
        x = jax.random.normal(k_x, (n, in_f), jnp.float32)
        mask = (jax.random.uniform(k_adj, (n, n)) < 0.1).astype(jnp.float32)
        adj = mask / (mask.sum(axis=1, keepdims=True) + 1.0)
        return x, adj, weight, bias

    key = jax.random.PRNGKey(0)
    k1, k2 = jax.random.split(key)

    # Case 1: demo shapes (N=64, 32 -> 128), mirrors reset_parameters().
    x, adj, weight, bias = make_case(k1, 64, 32, 128)
    ref = reference(x, adj, weight, bias)

    # f32 compute path: checks the reassociated / tiled / masked structure tightly.
    out_f32 = graph_convolution(x, adj, weight, bias, compute_dtype=jnp.float32)
    jax.block_until_ready(out_f32)
    assert out_f32.shape == ref.shape
    assert jnp.allclose(out_f32, ref, atol=1e-4, rtol=1e-4)

    # Default bf16 MXU-feed path (halves adj HBM traffic, f32 accumulation).
    out_bf16 = graph_convolution(x, adj, weight, bias)
    jax.block_until_ready(out_bf16)
    assert jnp.allclose(out_bf16, ref, atol=2e-2, rtol=2e-2)

    # bias=None path.
    out_nb = graph_convolution(x, adj, weight, None)
    jax.block_until_ready(out_nb)
    assert jnp.allclose(out_nb, ref - bias[None, :], atol=2e-2, rtol=2e-2)

    # Case 2: deliberately unaligned shapes (N=200, 24 -> 72) to exercise ragged
    # row tiles, the masked K tail and out_feature padding / column slicing.
    x2, adj2, weight2, bias2 = make_case(k2, 200, 24, 72)
    ref2 = reference(x2, adj2, weight2, bias2)
    out2 = graph_convolution(x2, adj2, weight2, bias2, compute_dtype=jnp.float32)
    jax.block_until_ready(out2)
    assert out2.shape == ref2.shape
    assert jnp.allclose(out2, ref2, atol=1e-4, rtol=1e-4)

    print("KERNEL_OK")
</pallas_src>

<mosaic_0001>
module attributes {stable_mosaic.version = 11 : i64} {
  func.func @_gcn_kernel(%arg0: i32, %arg1: i32, %arg2: memref<32x64xf32, #tpu.memory_space<vmem>>, %arg3: memref<64x128xf32, #tpu.memory_space<vmem>>, %arg4: memref<128x128xf32, #tpu.memory_space<vmem>>, %arg5: memref<1x128xf32, #tpu.memory_space<vmem>>, %arg6: memref<32x128xf32, #tpu.memory_space<vmem>>, %arg7: memref<32x128xf32, #tpu.memory_space<vmem>>) attributes {dimension_semantics = [#tpu.dimension_semantics<parallel>, #tpu.dimension_semantics<arbitrary>], iteration_bounds = array<i64: 2, 1>, scalar_prefetch = 0 : i64, scratch_operands = 1 : i64, tpu.core_type = #tpu.core_type<tc>, window_params = [{transform_indices = @transform_0, window_bounds = array<i64: 32, 64>}, {transform_indices = @transform_1, window_bounds = array<i64: 64, 128>}, {pipeline_mode = #tpu.pipeline_mode<synchronous>, transform_indices = @transform_2, window_bounds = array<i64: 128, 128>}, {pipeline_mode = #tpu.pipeline_mode<synchronous>, transform_indices = @transform_3, window_bounds = array<i64: 1, 128>}, {transform_indices = @transform_4, window_bounds = array<i64: 32, 128>}]} {
    %c0_i32 = arith.constant 0 : i32
    %0 = arith.cmpi eq, %arg1, %c0_i32 : i32
    %1 = arith.extui %0 : i1 to i32
    %c0_i32_0 = arith.constant 0 : i32
    %2 = arith.cmpi ne, %1, %c0_i32_0 : i32
    scf.if %2 {
      %cst_10 = arith.constant 0.000000e+00 : f32
      %12 = vector.broadcast %cst_10 : f32 to vector<32x128xf32>
      %c0_11 = arith.constant 0 : index
      %c0_12 = arith.constant 0 : index
      %13 = vector.load %arg7[%c0_11, %c0_12] : memref<32x128xf32, #tpu.memory_space<vmem>>, vector<32x128xf32>
      tpu.vector_store %arg7[%c0_11, %c0_12], %12 {strides = array<i32>} : memref<32x128xf32, #tpu.memory_space<vmem>>, vector<32x128xf32>,
    } else {
    }
    %c0 = arith.constant 0 : index
    %c0_1 = arith.constant 0 : index
    %3 = vector.load %arg2[%c0, %c0_1] : memref<32x64xf32, #tpu.memory_space<vmem>>, vector<32x64xf32>
    %c0_2 = arith.constant 0 : index
    %c0_3 = arith.constant 0 : index
    %4 = vector.load %arg3[%c0_2, %c0_3] : memref<64x128xf32, #tpu.memory_space<vmem>>, vector<64x128xf32>
    %c0_4 = arith.constant 0 : index
    %c0_5 = arith.constant 0 : index
    %5 = vector.load %arg7[%c0_4, %c0_5] : memref<32x128xf32, #tpu.memory_space<vmem>>, vector<32x128xf32>
    %cst = arith.constant dense<0.000000e+00> : vector<32x128xf32>
    %6 = tpu.matmul %3, %4, %cst {dimension_numbers = #tpu.dot_dimension_numbers<[1], [0], [0], [1], [0, 0, 1, 1], [], []>} : vector<32x64xf32>, vector<64x128xf32>, vector<32x128xf32> -> vector<32x128xf32>
    %7 = arith.addf %5, %6 : vector<32x128xf32>
    %c0_6 = arith.constant 0 : index
    %c0_7 = arith.constant 0 : index
    %8 = vector.load %arg7[%c0_6, %c0_7] : memref<32x128xf32, #tpu.memory_space<vmem>>, vector<32x128xf32>
    tpu.vector_store %arg7[%c0_6, %c0_7], %7 {strides = array<i32>} : memref<32x128xf32, #tpu.memory_space<vmem>>, vector<32x128xf32>,
    %c0_i32_8 = arith.constant 0 : i32
    %9 = arith.cmpi eq, %arg1, %c0_i32_8 : i32
    %10 = arith.extui %9 : i1 to i32
    %c0_i32_9 = arith.constant 0 : i32
    %11 = arith.cmpi ne, %10, %c0_i32_9 : i32
    scf.if %11 {
      %c0_10 = arith.constant 0 : index
      %c0_11 = arith.constant 0 : index
      %12 = vector.load %arg7[%c0_10, %c0_11] : memref<32x128xf32, #tpu.memory_space<vmem>>, vector<32x128xf32>
      %c0_12 = arith.constant 0 : index
      %c0_13 = arith.constant 0 : index
      %13 = vector.load %arg4[%c0_12, %c0_13] : memref<128x128xf32, #tpu.memory_space<vmem>>, vector<128x128xf32>
      %cst_14 = arith.constant dense<0.000000e+00> : vector<32x128xf32>
      %14 = tpu.matmul %12, %13, %cst_14 {dimension_numbers = #tpu.dot_dimension_numbers<[1], [0], [0], [1], [0, 0, 1, 1], [], []>} : vector<32x128xf32>, vector<128x128xf32>, vector<32x128xf32> -> vector<32x128xf32>
      %c0_15 = arith.constant 0 : index
      %c0_16 = arith.constant 0 : index
      %15 = vector.load %arg5[%c0_15, %c0_16] : memref<1x128xf32, #tpu.memory_space<vmem>>, vector<1x128xf32>
      %16 = vector.broadcast %15 : vector<1x128xf32> to vector<32x128xf32>
      %17 = arith.addf %14, %16 : vector<32x128xf32>
      %c0_17 = arith.constant 0 : index
      %c0_18 = arith.constant 0 : index
      %18 = vector.load %arg6[%c0_17, %c0_18] : memref<32x128xf32, #tpu.memory_space<vmem>>, vector<32x128xf32>
      tpu.vector_store %arg6[%c0_17, %c0_18], %17 {strides = array<i32>} : memref<32x128xf32, #tpu.memory_space<vmem>>, vector<32x128xf32>,
    } else {
    }
    return
  }
  func.func @transform_0(%arg0: i32, %arg1: i32) -> (i32, i32) {
    %c0_i32 = arith.constant 0 : i32
    return %arg0, %arg1 : i32, i32
  }
  func.func @transform_1(%arg0: i32, %arg1: i32) -> (i32, i32) {
    %c0_i32 = arith.constant 0 : i32
    %c0_i32_0 = arith.constant 0 : i32
    return %arg1, %c0_i32 : i32, i32
  }
  func.func @transform_2(%arg0: i32, %arg1: i32) -> (i32, i32) {
    %c0_i32 = arith.constant 0 : i32
    %c0_i32_0 = arith.constant 0 : i32
    %c0_i32_1 = arith.constant 0 : i32
    return %c0_i32, %c0_i32_0 : i32, i32
  }
  func.func @transform_3(%arg0: i32, %arg1: i32) -> (i32, i32) {
    %c0_i32 = arith.constant 0 : i32
    %c0_i32_0 = arith.constant 0 : i32
    %c0_i32_1 = arith.constant 0 : i32
    return %c0_i32, %c0_i32_0 : i32, i32
  }
  func.func @transform_4(%arg0: i32, %arg1: i32) -> (i32, i32) {
    %c0_i32 = arith.constant 0 : i32
    %c0_i32_0 = arith.constant 0 : i32
    return %arg0, %c0_i32 : i32, i32
  }
}

</mosaic_0001>

<bundles_post_ra>
// kernel: tpu_custom_call.1
= control target key start
LH: loop header
LB: loop body
LE: loop exit
PB: predicated region body
PF: predicated region fallthrough
CT: control target
= control target key end

     0   :  { %9 = vsyncpa [#allocation4], 0  ;;  %s1256_s0 = inlined_call_operand.hbm [shape: f32[64,64], index: 0, kind: input, shape index: {}]   ;;  %s1257_s1 = inlined_call_operand.hbm [shape: f32[64,128], index: 1, kind: input, shape index: {}]   ;;  %s1258_s2 = inlined_call_operand.hbm [shape: f32[128,128], index: 2, kind: input, shape index: {}]   ;;  %s1259_s3 = inlined_call_operand.vmem [shape: f32[1,128], index: 3, kind: input, shape index: {}]   ;;  %s1260_s4 = inlined_call_operand.hbm [shape: f32[64,128], index: 4, kind: output, shape index: {}]  }
   0x1   :  { %11 = vsyncpa [#allocation4 + $0x1], 0 }
   0x2   :  { %12 = vsyncpa [#allocation7], 0 }
   0x3   :  { %13 = vsyncpa [#allocation5], 0 }
   0x4   :  { %15 = vsyncpa [#allocation5 + $0x1], 0  ;;  %s1042_s15 = smov 0   ;;  %s1044_s16 = smov 0  }
   0x5   :  { %s1046_s17 = smov 0   ;;  %s1048_s18 = smov 0  }
   0x6   :  { %s1050_s19 = smov 0   ;;  %s1052_s20 = smov 0  }
   0x7 LB: > { %s638_s21 = sadd.s32 4294967295, %s1007_s20   ;;  %s639_s22 = sadd.s32 4294967294, %s1007_s20   ;;  %s1007_s20 = sphi %s1052_s20, %s21_s20   ;;  %s1003_s19 = sphi %s1050_s19, %s1279_s19   ;;  %s999_s18 = sphi %s1048_s18, %s1278_s18   ;;  %s995_s17 = sphi %s1046_s17, %s1277_s17   ;;  %s991_s16 = sphi %s1044_s16, %s1276_s16   ;;  %s987_s15 = sphi %s1042_s15, %s1275_s15  }
   0x8   : > { %p55_p0 = scmp.ne.s32.totalorder %s991_s16, %s987_s15  ;;  %p1076_p1 = scmp.eq.s32.totalorder %s638_s21, 0 }
   0x9   : > { %p1080_p2 = scmp.eq.s32.totalorder %s638_s21, 1  ;;  %p153_p3 = scmp.eq.s32.totalorder %s639_s22, 1 }
   0xa   : > { %p1086_p4 = por %p1076_p1, %p55_p0  ;;  %p640_p5 = scmp.ge.s32.totalorder %s1007_s20, 1 }
   0xb   : > { %p1091_p6 = por %p153_p3, %p55_p0  ;;  %p160_p7 = scmp.lt.s32.totalorder %s1007_s20, 3 }
   0xc   : > { %s1009_s28 = smov [#allocation6]   ;;  %s1010_s5 = smov [#allocation8]  }
   0xd   : > { %s1266_s26 = scalar_select %p1091_p6, 1, 0 }
   0xe   : > { %p1096_p8 = pnand %p640_p5, %p160_p7  ;;  %s175_s29 = sshll.u32 %s1009_s28, 4  ;;  %s176_s29 = int_to_ptr.vmem [resolvable:$true] %s175_s29 }
   0xf   : > { %s188_s6 = sshll.u32 %s1010_s5, 4  ;;  %s854_s7 = scalar_lea.vmem %s176_s29, 1024  ;;  %s189_s6 = int_to_ptr.vmem [resolvable:$true] %s188_s6 }
  0x10   : > { %p768_p9 = pneg %p1096_p8  ;;  %p855_p13 = scmp.ne.s32.totalorder %s176_s29, %s854_s7 }
  0x11   : > { %p862_p5 = scmp.lt.s32.totalorder %s176_s29, %s176_s29  ;;  %p863_p7 = scmp.lt.s32.totalorder %s854_s7, %s854_s7 }
  0x12   : > { %p1105_p11 = pnand %p768_p9, %p1076_p1 }
  0x13   : > { %p864_p10 = por %p863_p7, %p862_p5 }
  0x14   : > { %p845_p12 = pneg %p1105_p11 }
  0x16   : > { %p857_p0 = pnand %p855_p13, %p845_p12 }
  0x18   : > { %p858_p3 = pneg %p857_p0 }
  0x1a   : > { %p865_p9 = pnand %p864_p10, %p858_p3 }
  0x1c   : > { %868 = shalt.err (!%p865_p9)
}
  0x1d   : > { %s1261_s8 = smov 128   ;;  %s1262_s9 = smov 8  }
  0x1e   : > { %771 = dma.hbm_to_vmem [thread:$0]  (!%p1105_p11), %s1257_s1, 1024, %s176_s29, [#allocation7], %s1261_s8, %s1261_s8, %s1262_s9  }
  0x1f   : > { %s880_s12 = scalar_lea.vmem %s189_s6, 2048  ;;  %p888_p10 = scmp.lt.s32.totalorder %s189_s6, %s189_s6 }
  0x20   : > { %p881_p13 = scmp.ne.s32.totalorder %s189_s6, %s880_s12  ;;  %p889_p3 = scmp.lt.s32.totalorder %s880_s12, %s880_s12 }
  0x22   : > { %p883_p0 = pnand %p881_p13, %p845_p12  ;;  %p890_p7 = por %p889_p3, %p888_p10 }
  0x24   : > { %p884_p5 = pneg %p883_p0 }
  0x26   : > { %p891_p9 = pnand %p890_p7, %p884_p5 }
  0x28   : > { %894 = shalt.err (!%p891_p9)
}
  0x29   : > { %774 = dma.hbm_to_vmem [thread:$0]  (!%p1105_p11), %s1258_s2, 2048, %s189_s6, [#allocation7], %s1261_s8, %s1261_s8, %s1262_s9  }
  0x2a   : > { %s33_s21 = sadd.s32 1, %s1003_s19  ;;  %s42_s22 = sadd.s32 1, %s995_s17 }
  0x2b   : > { %p35_p12 = scmp.ge.s32.totalorder %s33_s21, 2  ;;  %p49_p13 = scmp.ne.s32.totalorder %s995_s17, %s991_s16 }
  0x2c   : > { %p50_p0 = scmp.eq.s32.totalorder %s1007_s20, 0  ;;  %p785_p5 = scmp.lt.s32.totalorder %s1007_s20, 2 }
  0x2d   : > { %s1281_s21 = smov (%p35_p12, %s33_s21), 0  ;;  %p1143_p3 = por %p1080_p2, %p49_p13 }
  0x2e   : > { %p51_p10 = por %p50_p0, %p49_p13  ;;  %s37_s29 = ssub.s32 %s1003_s19, %s1281_s21 }
  0x2f   : > { %s205_s30 = sand.u32 1, %s995_s17   ;;  %p40_p7 = scmp.eq.s32.totalorder %s37_s29, 0 }
  0x30   : > { %s644_s5 = sshll.u32 %s205_s30, 5  ;;  %s662_s6 = sshll.u32 %s1003_s19, 9 }
  0x31   : > { %s1152_s7 = scalar_select %p40_p7, %s995_s17, %s42_s22  }
  0x32   : > { %s216_s12 = scalar_lea.hbm %s1256_s0, %s662_s6  ;;  %s209_s13 = scalar_lea.vmem [#allocation3], %s644_s5 }
  0x33   : > { %s217_s14 = sshll.u32 %s209_s13, 4  ;;  %p1159_p11 = pnand %p785_p5, %p51_p10  ;;  %s218_s14 = int_to_ptr.vmem [resolvable:$true] %s217_s14 }
  0x34   : > { %s206_s8 = scalar_lea.sflag [#allocation4], %s205_s30  ;;  %s908_s29 = scalar_lea.vmem %s218_s14, 512 }
  0x35   : > { %p897_p2 = pneg %p1159_p11  ;;  %p909_p9 = scmp.ne.s32.totalorder %s218_s14, %s908_s29 }
  0x36   : > { %s1013_s22 = smov [#allocation3]  }
  0x37   : > { %p911_p12 = pnand %p909_p9, %p897_p2  ;;  %s913_s9 = sshll.u32 %s1013_s22, 4  ;;  %s914_s9 = int_to_ptr.vmem [resolvable:$false] %s913_s9 }
  0x38   : > { %s915_s6 = scalar_lea.vmem %s914_s9, 1024  ;;  %p916_p0 = scmp.lt.s32.totalorder %s218_s14, %s914_s9 }
  0x39   : > { %p912_p13 = pneg %p911_p12  ;;  %p917_p7 = scmp.lt.s32.totalorder %s915_s6, %s908_s29 }
  0x3b   : > { %p918_p6 = por %p917_p7, %p916_p0 }
  0x3d   : > { %p919_p5 = pnand %p918_p6, %p912_p13 }
  0x3f   : > { %922 = shalt.err (!%p919_p5)
}
  0x40   : > { %s1271_s5 = smov 8   ;;  %s1272_s10 = smov 128  }
  0x41   : > { %778 = dma.hbm_to_vmem [thread:$0]  (!%p1159_p11), %s216_s12, 512, %s218_s14, %s206_s8, %s1272_s10, %s1272_s10, %s1271_s5  }
  0x42   : > { %229 = sbr.rel (%p1096_p8) target bundleno = 502 (0x1f6), region = 36  ;;  %s1173_s30 = sand.u32 (!%p1096_p8), 1, %s991_s16  }
  0x43   : > { %s648_s9 = sshll.u32 (!%p1096_p8), %s1173_s30, 5  ;;  %s232_s11 = scalar_lea.sflag (!%p1096_p8), [#allocation4], %s1173_s30 }
  0x44   : > { %s1179_s13 = scalar_lea.vmem (!%p1096_p8), [#allocation3], %s648_s9 }
  0x47   : > { %974 = dma.done.wait (%p1086_p4), %s232_s11, 512  }
  0x48   : > { %976 = vsyncadd (%p1086_p4), %s232_s11, 4294966784 }
  0x49   : > { %978 = dma.done.wait (%p1076_p1), [#allocation7], 3072  }
  0x4a   : > { %980 = vsyncadd (%p1076_p1), [#allocation7], 4294964224  ;;  %v290_v0 = vld [vmem:[#allocation6 + $0x38] sm:$0xff]  ;;  %v289_v1 = vld [vmem:[#allocation6 + $0x30] sm:$0xff]  ;;  %vm295_vm0 = vcmask 523264   ;;  %s267_s27 = scalar_lea.vmem [#allocation9], %s648_s9 }
  0x4b   : > { %696 = vmatprep.subr.mxu0 %v290_v0  ;;  %v288_v2 = vld [vmem:[#allocation6 + $0x28] sm:$0xff]  ;;  %v279_v3 = vld [vmem:[%s1179_s13] sm:$0xff]  ;;  %v423_v5 = vld [vmem:[#allocation8 + $0x78] sm:$0xff]  ;;  %s534_s8 = sshll.u32 %s267_s27, 4  ;;  %s663_s12 = sshll.u32 %s999_s18, 9  ;;  %s1203_s8 = int_to_ptr.vmem [resolvable:$true] %s534_s8 }
  0x4c   : > { %697 = vmatpush3.msra.mxu0 %v290_v0  ;;  %712 = vmatprep.mubr.msk.f32.mxu0 %vm295_vm0, %v279_v3  ;;  %v287_v4 = vld [vmem:[#allocation6 + $0x20] sm:$0xff]  ;;  %v422_v6 = vld [vmem:[#allocation8 + $0x70] sm:$0xff]  ;;  %v286_v7 = vld [vmem:[#allocation6 + $0x18] sm:$0xff]  ;;  %s1208_s29 = scalar_lea.hbm %s1260_s4, %s663_s12  ;;  %s521_s22 = scalar_lea.sflag [#allocation5], %s1173_s30 }
  0x4d   : > { %698 = vmatprep.subr.mxu0 %v289_v1  ;;  %718 = vmatprep.subr.mxu1 %v423_v5  ;;  %v421_v8 = vld [vmem:[#allocation8 + $0x68] sm:$0xff]  ;;  %v285_v9 = vld [vmem:[#allocation6 + $0x10] sm:$0xff]  ;;  %v420_v10 = vld [vmem:[#allocation8 + $0x60] sm:$0xff]  ;;  %s923_s6 = scalar_lea.vmem %s1203_s8, 512  ;;  %s1014_s18 = smov [#allocation9]  }
  0x4e   : > { %699 = vmatpush3.msra.mxu0 %v289_v1  ;;  %719 = vmatpush3.msra.mxu1 %v423_v5  ;;  %v284_v11 = vld [vmem:[#allocation6 + $0x8] sm:$0xff]  ;;  %v419_v12 = vld [vmem:[#allocation8 + $0x58] sm:$0xff]  ;;  %v283_v13 = vld [vmem:[#allocation6] sm:$0xff]  ;;  %p924_p1 = scmp.ne.s32.totalorder %s1203_s8, %s923_s6  ;;  %s927_s5 = sshll.u32 %s1014_s18, 4  ;;  %s928_s5 = int_to_ptr.vmem [resolvable:$false] %s927_s5 }
  0x4f   : > { %700 = vmatprep.subr.mxu0 %v288_v2  ;;  %720 = vmatprep.subr.mxu1 %v422_v6  ;;  %v418_v14 = vld [vmem:[#allocation8 + $0x50] sm:$0xff]  ;;  %v280_v15 = vld [vmem:[%s1179_s13 + $0x8] sm:$0xff]  ;;  %v416_v18 = vld [vmem:[#allocation8 + $0x40] sm:$0xff]  ;;  %s929_s10 = scalar_lea.vmem %s928_s5, 1024  ;;  %p930_p8 = scmp.lt.s32.totalorder %s1203_s8, %s928_s5 }
  0x50   : > { %701 = vmatpush3.msra.mxu0 %v288_v2  ;;  %721 = vmatpush3.msra.mxu1 %v422_v6  ;;  %v417_v16 = vld [vmem:[#allocation8 + $0x48] sm:$0xff]  ;;  %v281_v17 = vld [vmem:[%s1179_s13 + $0x10] sm:$0xff]  ;;  %v282_v19 = vld [vmem:[%s1179_s13 + $0x18] sm:$0xff]  ;;  %p925_p4 = pnand %p924_p1, %p1143_p3  ;;  %p931_p10 = scmp.lt.s32.totalorder %s929_s10, %s923_s6 }
  0x51   : > { %702 = vmatprep.subr.mxu0 %v287_v4  ;;  %722 = vmatprep.subr.mxu1 %v421_v8  ;;  %v415_v20 = vld [vmem:[#allocation8 + $0x38] sm:$0xff]  ;;  %v414_v21 = vld [vmem:[#allocation8 + $0x30] sm:$0xff]  ;;  %v413_v22 = vld [vmem:[#allocation8 + $0x28] sm:$0xff] }
  0x52   : > { %703 = vmatpush3.msra.mxu0 %v287_v4  ;;  %723 = vmatpush3.msra.mxu1 %v421_v8  ;;  %v412_v23 = vld [vmem:[#allocation8 + $0x20] sm:$0xff]  ;;  %v411_v24 = vld [vmem:[#allocation8 + $0x18] sm:$0xff]  ;;  %v410_v25 = vld [vmem:[#allocation8 + $0x10] sm:$0xff]  ;;  %p926_p6 = pneg %p925_p4  ;;  %p932_p11 = por %p931_p10, %p930_p8 }
  0x53   : > { %704 = vmatprep.subr.mxu0 %v286_v7  ;;  %724 = vmatprep.subr.mxu1 %v420_v10  ;;  %v409_v26 = vld [vmem:[#allocation8 + $0x8] sm:$0xff]  ;;  %v408_v27 = vld [vmem:[#allocation8] sm:$0xff] }
  0x54   : > { %705 = vmatpush3.msra.mxu0 %v286_v7  ;;  %725 = vmatpush3.msra.mxu1 %v420_v10  ;;  %v656_v32 = vld [vmem:[%s1259_s3] ss:$0 sm:$0xff]  ;;  %p933_p2 = pnand %p932_p11, %p926_p6 }
  0x55   : > { %706 = vmatprep.subr.mxu0 %v285_v9  ;;  %726 = vmatprep.subr.mxu1 %v419_v12 }
  0x56   : > { %707 = vmatpush3.msra.mxu0 %v285_v9  ;;  %727 = vmatpush3.msra.mxu1 %v419_v12 }
  0x57   : > { %708 = vmatprep.subr.mxu0 %v284_v11  ;;  %728 = vmatprep.subr.mxu1 %v418_v14 }
  0x58   : > { %709 = vmatpush3.msra.mxu0 %v284_v11  ;;  %729 = vmatpush3.msra.mxu1 %v418_v14 }
  0x59   : > { %710 = vmatprep.subr.mxu0 %v283_v13  ;;  %730 = vmatprep.subr.mxu1 %v417_v16 }
  0x5a   : > { %711 = vmatpush3.msra.mxu0 %v283_v13  ;;  %731 = vmatpush3.msra.mxu1 %v417_v16 }
  0x5b   : > { %713 = vmatmul.mubr.msk.f32.vlgmr.msra.gmra.mxu0 %vm295_vm0, %v280_v15  ;;  %732 = vmatprep.subr.mxu1 %v416_v18 }
  0x5c   : > { %715 = vmatprep.mubr.msk.f32.mxu0 %vm295_vm0, %v281_v17  ;;  %733 = vmatpush3.msra.mxu1 %v416_v18 }
  0x5d   : > { %734 = vmatprep.subr.mxu1 %v415_v20 }
  0x5e   : > { %735 = vmatpush3.msra.mxu1 %v415_v20 }
  0x5f   : > { %716 = vmatmul.mubr.msk.f32.gmra.mxu0 %vm295_vm0, %v282_v19  ;;  %736 = vmatprep.subr.mxu1 %v414_v21 }
  0x60   : > { %737 = vmatpush3.msra.mxu1 %v414_v21 }
  0x61   : > { %738 = vmatprep.subr.mxu1 %v413_v22 }
  0x62   : > { %739 = vmatpush3.msra.mxu1 %v413_v22 }
  0x63   : > { %740 = vmatprep.subr.mxu1 %v412_v23 }
  0x64   : > { %741 = vmatpush3.msra.mxu1 %v412_v23 }
  0x65   : > { %742 = vmatprep.subr.mxu1 %v411_v24 }
  0x66   : > { %743 = vmatpush3.msra.mxu1 %v411_v24 }
  0x67   : > { %744 = vmatprep.subr.mxu1 %v410_v25 }
  0x68   : > { %745 = vmatpush3.msra.mxu1 %v410_v25 }
  0x69   : > { %746 = vmatprep.subr.mxu1 %v409_v26 }
  0x6a   : > { %747 = vmatpush3.msra.mxu1 %v409_v26 }
  0x6b   : > { %748 = vmatprep.subr.mxu1 %v408_v27 }
  0x6c   : > { %749 = vmatpush3.msra.mxu1 %v408_v27 }
 0x11b   : > { %v714_v28 = vpop.f32.mrf.mxu0 }
 0x11d   : > { %v374_v29 = vpop.f32.mrf.mxu0 }
 0x11e   : > { %750 = vmatprep.mubr.f32.mxu1 %v374_v29 }
 0x11f   : > { %v717_v30 = vpop.f32.mrf.mxu0  ;;  %751 = vmatmul.mubr.f32.vlgmr.msra.gmra.mxu1 %v714_v28 }
 0x121   : > { %v384_v31 = vpop.f32.mrf.mxu0 }
 0x122   : > { %753 = vmatprep.mubr.f32.mxu1 %v384_v31 }
 0x123   : > { %754 = vmatmul.mubr.f32.gmra.mxu1 %v717_v30 }
 0x1df   : > { %v752_v33 = vpop.f32.mrf.mxu1 }
 0x1e0   : > { %v503_v34 = vadd.f32 %v752_v33, %v656_v32 }
 0x1e1   : > { %v497_v35 = vpop.f32.mrf.mxu1 }
 0x1e2   : > { %517 = vst [vmem:[%s267_s27 + $0x8] sm:$0xff] %v503_v34  ;;  %v498_v36 = vadd.f32 %v656_v32, %v497_v35 }
 0x1e3   : > { %v755_v37 = vpop.f32.mrf.mxu1 }
 0x1e4   : > { %516 = vst [vmem:[%s267_s27] sm:$0xff] %v498_v36  ;;  %v513_v38 = vadd.f32 %v755_v37, %v656_v32 }
 0x1e5   : > { %v507_v39 = vpop.f32.mrf.mxu1 }
 0x1e6   : > { %519 = vst [vmem:[%s267_s27 + $0x18] sm:$0xff] %v513_v38  ;;  %v508_v40 = vadd.f32 %v656_v32, %v507_v39 }
 0x1e8   : > { %518 = vst [vmem:[%s267_s27 + $0x10] sm:$0xff] %v508_v40 }
 0x1e9   : > { %936 = shalt.err (!%p933_p2)
}
 0x1ea   : > { %s937_s9 = scalar_lea.hbm %s1208_s29, 512  ;;  %s941_s23 = scalar_lea.hbm %s1260_s4, 1024 }
 0x1eb   : > { %p938_p9 = scmp.ne.s32.totalorder %s1208_s29, %s937_s9  ;;  %p942_p0 = scmp.lt.s32.totalorder %s1208_s29, %s1260_s4 }
 0x1ec   : > { %p943_p7 = scmp.lt.s32.totalorder %s941_s23, %s937_s9 }
 0x1ed   : > { %p939_p12 = pnand %p938_p9, %p1143_p3 }
 0x1ee   : > { %p944_p5 = por %p943_p7, %p942_p0 }
 0x1ef   : > { %p940_p13 = pneg %p939_p12 }
 0x1f1   : > { %p945_p1 = pnand %p944_p5, %p940_p13 }
 0x1f3   : > { %948 = shalt.err (!%p945_p1)
}
 0x1f4   : > { %s1015_s12 = smov 128   ;;  %s1016_s14 = smov 8  }
 0x1f5   : > { %766 = dma.vmem_to_hbm [thread:$0]  (%p1143_p3), %s1203_s8, 512, %s1208_s29, %s521_s22, %s1015_s12, %s1015_s12, %s1016_s14  }
 0x1f6 PF: > { %s549_s24 = sand.u32 1, %s987_s15   ;;  %p1273_p4 = scmp.ne.s32.totalorder %s1266_s26, 0 }
 0x1f7   : > { %p1274_p6 = scmp.ge.s32.totalorder %s1007_s20, 2  ;;  %s550_s6 = scalar_lea.sflag [#allocation5], %s549_s24 }
 0x1f9   : > { %p780_p8 = pnand %p1274_p6, %p1273_p4 }
 0x1fb   : > { %p781_p10 = pneg %p780_p8 }
 0x1fd   : > { %982 = dma.done.wait (%p781_p10), %s550_s6, 512  }
 0x1fe   : > { %984 = vsyncadd (%p781_p10), %s550_s6, 4294966784  ;;  %s21_s20 = sadd.s32 1, %s1007_s20   ;;  %s1275_s15 = smov %s991_s16 }
 0x1ff   : > { %p18_p11 = scmp.ge.s32.totalorder %s21_s20, 4   ;;  %s1276_s16 = smov %s995_s17 }
 0x200   : > { %s1277_s17 = smov %s1152_s7  ;;  %s1278_s18 = smov %s1003_s19 }
 0x201   : > { %s1279_s19 = smov %s1281_s21  ;;  %20 = sbr.rel (!%p18_p11) target bundleno = 7 (0x7), region = 98 }
 0x206   :  { %555 = vsyncpa [#allocation4], 1 }
 0x207   :  { %557 = vsyncpa [#allocation4 + $0x1], 1 }
 0x208   :  { %558 = vsyncpa [#allocation7], 1 }
 0x209   :  { %559 = vsyncpa [#allocation5], 1 }
 0x20a   :  { %561 = vsyncpa [#allocation5 + $0x1], 1 }

</bundles_post_ra>
